<compile_context>
chip_gen: v7x
topology: tpu7x:2x2x1
jax: 0.10.0
libtpu: 0.0.40
codegen_flags: <defaults>
</compile_context>

<pallas_src>
import functools

import jax
import jax.numpy as jnp
from jax.experimental import pallas as pl
from jax.experimental.pallas import tpu as pltpu

IGNORE_INDEX = -100
_LANES = 128
_NEG_INF = -1e30


def _fused_ce_kernel(h_ref, lbl_ref, w_ref, loss_ref, m_sc, l_sc, t_sc, *,
                     vocab_size, block_v, need_vmask):
    """Grid = (row_blocks, vocab_blocks); vocab is the inner reduction axis.

    Online logsumexp + target-logit gather per row block, kept as lane-dense
    (tn, 128) partials; per-row losses are written on the last vocab tile.
    """
    j = pl.program_id(1)
    nj = pl.num_programs(1)

    @pl.when(j == 0)
    def _():
        m_sc[...] = jnp.full_like(m_sc, -jnp.inf)
        l_sc[...] = jnp.zeros_like(l_sc)
        t_sc[...] = jnp.zeros_like(t_sc)

    # (tn, tv) logits on the MXU with f32 accumulation.  RHS contracts on its
    # last dim (hidden @ W.T, the same "NT" form flash attention uses), so no
    # wrapper-side transpose of the (V, H) weight is needed.
    logits = jax.lax.dot_general(
        h_ref[...], w_ref[...],
        dimension_numbers=(((1,), (1,)), ((), ())),
        preferred_element_type=jnp.float32)
    tn = logits.shape[0]

    labels = lbl_ref[...]                                    # (tn, 1) int32
    col = jax.lax.broadcasted_iota(jnp.int32, (tn, block_v), 1) + j * block_v

    if need_vmask:
        # Ragged last vocab tile / padded weight rows: mask those columns out.
        logits = jnp.where(col < vocab_size, logits, jnp.float32(_NEG_INF))

    # Target-logit contribution present in this vocab tile.
    tgt = jnp.where(col == labels, logits, jnp.float32(0.0))

    # Lane-dense (tn, 128) partial reductions via a VALU tree over 128-lane
    # groups: no per-tile cross-lane (XLU) reduction, no (tn, 1) lane-sparse
    # accumulators.
    groups = block_v // _LANES

    def grp(x, k):
        return x[:, k * _LANES:(k + 1) * _LANES]

    tile_max = grp(logits, 0)
    tgt_part = grp(tgt, 0)
    for k in range(1, groups):
        tile_max = jnp.maximum(tile_max, grp(logits, k))
        tgt_part = tgt_part + grp(tgt, k)

    m_prev = m_sc[...]
    m_new = jnp.maximum(m_prev, tile_max)                    # (tn, 128)
    p_sum = jnp.exp(grp(logits, 0) - m_new)
    for k in range(1, groups):
        p_sum = p_sum + jnp.exp(grp(logits, k) - m_new)

    l_sc[...] = jnp.exp(m_prev - m_new) * l_sc[...] + p_sum
    m_sc[...] = m_new
    t_sc[...] = t_sc[...] + tgt_part

    @pl.when(j == nj - 1)
    def _():
        # Single cross-lane collapse per row block.
        m_lane = m_sc[...]
        m_row = jnp.max(m_lane, axis=-1, keepdims=True)                # (tn,1)
        l_row = jnp.sum(l_sc[...] * jnp.exp(m_lane - m_row),
                        axis=-1, keepdims=True)                        # (tn,1)
        t_row = jnp.sum(t_sc[...], axis=-1, keepdims=True)             # (tn,1)
        valid = lbl_ref[...] != IGNORE_INDEX
        # per-row loss = logsumexp(logits_row) - logits_row[label]
        loss_ref[...] = jnp.where(valid, m_row + jnp.log(l_row) - t_row,
                                  jnp.float32(0.0))


def _round_up(x, m):
    return ((x + m - 1) // m) * m


def _cdiv(a, b):
    return (a + b - 1) // b


def _vmem_capacity_bytes():
    try:
        return int(pltpu.get_tpu_info().vmem_capacity_bytes)
    except Exception:
        return 64 * 1024 * 1024   # conservative fallback (v7x per-core VMEM)


def _estimate_vmem_bytes(tn, tv, H, itemsize):
    hidden = 2 * tn * H * itemsize          # double-buffered hidden tile
    weight = 2 * tv * H * itemsize          # double-buffered weight tile
    logits = 3 * tn * tv * 4                # f32 logits + elementwise temps
    scratch = 3 * tn * _LANES * 4           # m / l / t lane-dense accumulators
    small = 4 * tn * 4                      # labels + per-row-loss blocks
    return int(1.25 * (hidden + weight + logits + scratch + small))


def _pick_tiles(N, V, H, itemsize, budget):
    """Largest row tile (then vocab tile) that fits the VMEM budget."""
    tv = min(1024, _round_up(V, _LANES))
    tn_cap = _round_up(min(N, 1024), 16)
    candidates = (1024, 768, 512, 384, 256, 192, 128, 96, 64, 48, 32, 16)
    tn = None
    while tn is None:
        for cand in candidates:
            if cand <= tn_cap and _estimate_vmem_bytes(cand, tv, H,
                                                       itemsize) <= budget:
                tn = cand
                break
        if tn is None:
            if tv <= _LANES:
                tn = 16
            else:
                tv = max(_LANES, (tv // 2 // _LANES) * _LANES)
    # Keep >= 2 row blocks so the "parallel" row axis can megacore-shard (v7x).
    if N >= 256 and _cdiv(N, tn) < 2:
        tn = _round_up(_cdiv(N, 2), 16)
    return tn, tv


def fused_cross_entropy_lm_head(hidden_states, labels, weight, *,
                                tn=None, tv=None,
                                compute_dtype=jnp.bfloat16):
    """hidden_states: (N, H); labels: (N,) int; weight: (V, H) (F.linear layout).

    Returns float32 scalar = sum of CE over tokens with label != -100.
    Matmul operands are cast to `compute_dtype` (default bf16, the MXU-native
    dtype on v5e/v6e/v7x); logsumexp / target gather / accumulation stay f32.
    Store the LM-head weight in `compute_dtype` already to skip the cast copy.
    """
    N, H = hidden_states.shape
    V, H2 = weight.shape
    assert H == H2, (hidden_states.shape, weight.shape)

    if compute_dtype is not None and hidden_states.dtype != compute_dtype:
        hidden_states = hidden_states.astype(compute_dtype)
    if compute_dtype is not None and weight.dtype != compute_dtype:
        # NOTE: full (V, H) HBM read+write; keep the weight in compute_dtype.
        weight = weight.astype(compute_dtype)

    itemsize = jnp.dtype(hidden_states.dtype).itemsize
    vmem_cap = _vmem_capacity_bytes()
    auto_tn, auto_tv = _pick_tiles(N, V, H, itemsize, int(0.75 * vmem_cap))
    tn = auto_tn if tn is None else tn
    tv = auto_tv if tv is None else tv

    labels2d = labels.reshape(N, 1).astype(jnp.int32)

    # No full-size padding: ragged last blocks are handled by the cdiv grid
    # (garbage rows never reach the clipped output writeback) and by the
    # in-kernel vocab-column mask.  Only sub-tile inputs are (cheaply) padded
    # so a block never exceeds the array extent.
    if N < tn:
        pad = tn - N
        hidden_states = jnp.pad(hidden_states, ((0, pad), (0, 0)))
        labels2d = jnp.pad(labels2d, ((0, pad), (0, 0)),
                           constant_values=IGNORE_INDEX)
    if V < tv:
        weight = jnp.pad(weight, ((0, tv - V), (0, 0)))

    N_arr = hidden_states.shape[0]
    V_arr = weight.shape[0]
    grid_n = _cdiv(N_arr, tn)
    grid_v = _cdiv(V_arr, tv)
    need_vmask = (V % tv) != 0

    vmem_limit = int(min(max(_estimate_vmem_bytes(tn, tv, H, itemsize),
                             32 * 1024 * 1024),
                         int(0.85 * vmem_cap)))

    cost = pl.CostEstimate(
        flops=int(2 * N_arr * V_arr * H),
        transcendentals=int(N_arr * V_arr),
        bytes_accessed=int(grid_n * V_arr * H * itemsize
                           + N_arr * H * itemsize + 8 * N_arr),
    )

    kernel = functools.partial(_fused_ce_kernel, vocab_size=V, block_v=tv,
                               need_vmask=need_vmask)

    per_row = pl.pallas_call(
        kernel,
        out_shape=jax.ShapeDtypeStruct((N_arr, 1), jnp.float32),
        grid=(grid_n, grid_v),
        in_specs=[
            pl.BlockSpec((tn, H), lambda i, j: (i, 0)),     # hidden rows
            pl.BlockSpec((tn, 1), lambda i, j: (i, 0)),     # labels
            pl.BlockSpec((tv, H), lambda i, j: (j, 0)),     # LM-head tile
        ],
        out_specs=pl.BlockSpec((tn, 1), lambda i, j: (i, 0)),
        scratch_shapes=[
            pltpu.VMEM((tn, _LANES), jnp.float32),   # running max (lane partials)
            pltpu.VMEM((tn, _LANES), jnp.float32),   # running sum-exp
            pltpu.VMEM((tn, _LANES), jnp.float32),   # target-logit partials
        ],
        compiler_params=pltpu.CompilerParams(
            dimension_semantics=("parallel", "arbitrary"),
            vmem_limit_bytes=vmem_limit),
        cost_estimate=cost,
    )(hidden_states, labels2d, weight)

    # Ignored-label rows (and any tiny-input pad rows) hold exact zeros.
    return jnp.sum(per_row)


# TODO(synk): the PyTorch forward also stashes weights.grad / grad_input for
# its custom backward; only the forward loss is implemented here.


if __name__ == "__main__":
    def ref_loss(h, lbl, w):
        logits = h.astype(jnp.float32) @ w.astype(jnp.float32).T
        logp = jax.nn.log_softmax(logits, axis=-1)
        valid = lbl != IGNORE_INDEX
        safe = jnp.where(valid, lbl, 0)
        nll = -jnp.take_along_axis(logp, safe[:, None], axis=1)[:, 0]
        return jnp.sum(jnp.where(valid, nll, 0.0))

    def as_bf16_f32(x):
        return x.astype(jnp.bfloat16).astype(jnp.float32)

    key = jax.random.PRNGKey(0)

    # Case 1: batch=2, seq=8 -> N=16 tokens, hidden=32, vocab=256.
    batch, seq, hidden_size, vocab_size = 2, 8, 32, 256
    N = batch * seq
    k_h, k_w, k_l = jax.random.split(key, 3)
    h = jax.random.normal(k_h, (N, hidden_size), dtype=jnp.float32)
    w = 0.02 * jax.random.normal(k_w, (vocab_size, hidden_size),
                                 dtype=jnp.float32)
    lbl = jax.random.randint(k_l, (N,), 0, vocab_size, dtype=jnp.int32)
    lbl = lbl.at[0].set(IGNORE_INDEX).at[5].set(IGNORE_INDEX)

    # Default bf16 compute path: tight vs. bf16-rounded reference, loose vs f32.
    loss_bf16 = jax.block_until_ready(fused_cross_entropy_lm_head(h, lbl, w))
    ref_b = ref_loss(as_bf16_f32(h), lbl, as_bf16_f32(w))
    ref_f = ref_loss(h, lbl, w)
    assert jnp.allclose(loss_bf16, ref_b, rtol=2e-3, atol=5e-2), (loss_bf16, ref_b)
    assert jnp.allclose(loss_bf16, ref_f, rtol=3e-2, atol=5e-1), (loss_bf16, ref_f)

    # f32 compute path: tight comparison (checks the algorithm exactly).
    loss_f32 = jax.block_until_ready(
        fused_cross_entropy_lm_head(h, lbl, w, compute_dtype=jnp.float32))
    assert jnp.allclose(loss_f32, ref_f, rtol=1e-4, atol=1e-2), (loss_f32, ref_f)

    # Case 2: unaligned N / V (sub-tile) to exercise tiny-pad + vocab-mask path.
    k_h2, k_w2, k_l2 = jax.random.split(jax.random.PRNGKey(1), 3)
    N2, V2 = 10, 300
    h2 = jax.random.normal(k_h2, (N2, hidden_size), dtype=jnp.float32)
    w2 = 0.02 * jax.random.normal(k_w2, (V2, hidden_size), dtype=jnp.float32)
    l2 = jax.random.randint(k_l2, (N2,), 0, V2, dtype=jnp.int32)
    l2 = l2.at[3].set(IGNORE_INDEX)
    loss2 = jax.block_until_ready(
        fused_cross_entropy_lm_head(h2, l2, w2, compute_dtype=jnp.float32))
    ref2 = ref_loss(h2, l2, w2)
    assert jnp.allclose(loss2, ref2, rtol=1e-4, atol=1e-2), (loss2, ref2)

    # Case 3: multi-block grid with ragged last row AND vocab blocks (no pads).
    k_h3, k_w3, k_l3 = jax.random.split(jax.random.PRNGKey(2), 3)
    N3, V3 = 272, 520
    h3 = jax.random.normal(k_h3, (N3, hidden_size), dtype=jnp.float32)
    w3 = 0.02 * jax.random.normal(k_w3, (V3, hidden_size), dtype=jnp.float32)
    l3 = jax.random.randint(k_l3, (N3,), 0, V3, dtype=jnp.int32)
    l3 = l3.at[7].set(IGNORE_INDEX).at[100].set(IGNORE_INDEX)
    loss3 = jax.block_until_ready(
        fused_cross_entropy_lm_head(h3, l3, w3, tn=128, tv=256,
                                    compute_dtype=jnp.float32))
    ref3 = ref_loss(h3, l3, w3)
    assert jnp.allclose(loss3, ref3, rtol=1e-4, atol=5e-2), (loss3, ref3)

    print("KERNEL_OK")
</pallas_src>

<mosaic_0001>
module attributes {stable_mosaic.version = 11 : i64} {
  func.func @_fused_ce_kernel(%arg0: i32, %arg1: i32, %arg2: memref<16x32xbf16, #tpu.memory_space<vmem>>, %arg3: memref<16x1xi32, #tpu.memory_space<vmem>>, %arg4: memref<256x32xbf16, #tpu.memory_space<vmem>>, %arg5: memref<16x1xf32, #tpu.memory_space<vmem>>, %arg6: memref<16x128xf32, #tpu.memory_space<vmem>>, %arg7: memref<16x128xf32, #tpu.memory_space<vmem>>, %arg8: memref<16x128xf32, #tpu.memory_space<vmem>>) attributes {dimension_semantics = [#tpu.dimension_semantics<parallel>, #tpu.dimension_semantics<arbitrary>], iteration_bounds = array<i64: 1, 1>, scalar_prefetch = 0 : i64, scratch_operands = 3 : i64, tpu.core_type = #tpu.core_type<tc>, window_params = [{transform_indices = @transform_0, window_bounds = array<i64: 16, 32>}, {transform_indices = @transform_1, window_bounds = array<i64: 16, 1>}, {transform_indices = @transform_2, window_bounds = array<i64: 256, 32>}, {transform_indices = @transform_3, window_bounds = array<i64: 16, 1>}]} {
    %c0_i32 = arith.constant 0 : i32
    %0 = arith.cmpi eq, %arg1, %c0_i32 : i32
    %1 = arith.extui %0 : i1 to i32
    %c0_i32_0 = arith.constant 0 : i32
    %2 = arith.cmpi ne, %1, %c0_i32_0 : i32
    scf.if %2 {
      %cst_21 = arith.constant 0xFF800000 : f32
      %43 = vector.broadcast %cst_21 : f32 to vector<16x128xf32>
      %c0_22 = arith.constant 0 : index
      %c0_23 = arith.constant 0 : index
      %44 = vector.load %arg6[%c0_22, %c0_23] : memref<16x128xf32, #tpu.memory_space<vmem>>, vector<16x128xf32>
      tpu.vector_store %arg6[%c0_22, %c0_23], %43 {strides = array<i32>} : memref<16x128xf32, #tpu.memory_space<vmem>>, vector<16x128xf32>,
      %cst_24 = arith.constant 0.000000e+00 : f32
      %45 = vector.broadcast %cst_24 : f32 to vector<16x128xf32>
      %c0_25 = arith.constant 0 : index
      %c0_26 = arith.constant 0 : index
      %46 = vector.load %arg7[%c0_25, %c0_26] : memref<16x128xf32, #tpu.memory_space<vmem>>, vector<16x128xf32>
      tpu.vector_store %arg7[%c0_25, %c0_26], %45 {strides = array<i32>} : memref<16x128xf32, #tpu.memory_space<vmem>>, vector<16x128xf32>,
      %cst_27 = arith.constant 0.000000e+00 : f32
      %47 = vector.broadcast %cst_27 : f32 to vector<16x128xf32>
      %c0_28 = arith.constant 0 : index
      %c0_29 = arith.constant 0 : index
      %48 = vector.load %arg8[%c0_28, %c0_29] : memref<16x128xf32, #tpu.memory_space<vmem>>, vector<16x128xf32>
      tpu.vector_store %arg8[%c0_28, %c0_29], %47 {strides = array<i32>} : memref<16x128xf32, #tpu.memory_space<vmem>>, vector<16x128xf32>,
    } else {
    }
    %c0 = arith.constant 0 : index
    %c0_1 = arith.constant 0 : index
    %3 = vector.load %arg2[%c0, %c0_1] : memref<16x32xbf16, #tpu.memory_space<vmem>>, vector<16x32xbf16>
    %c0_2 = arith.constant 0 : index
    %c0_3 = arith.constant 0 : index
    %4 = vector.load %arg4[%c0_2, %c0_3] : memref<256x32xbf16, #tpu.memory_space<vmem>>, vector<256x32xbf16>
    %cst = arith.constant dense<0.000000e+00> : vector<16x256xf32>
    %5 = tpu.matmul %3, %4, %cst {dimension_numbers = #tpu.dot_dimension_numbers<[1], [1], [0], [0], [0, 0, 1, 0], [], []>} : vector<16x32xbf16>, vector<256x32xbf16>, vector<16x256xf32> -> vector<16x256xf32>
    %c0_4 = arith.constant 0 : index
    %c0_5 = arith.constant 0 : index
    %6 = vector.load %arg3[%c0_4, %c0_5] : memref<16x1xi32, #tpu.memory_space<vmem>>, vector<16x1xi32>
    %7 = tpu.iota {dimensions = array<i32: 1>} : vector<16x256xi32>
    %c256_i32 = arith.constant 256 : i32
    %8 = arith.muli %arg1, %c256_i32 : i32
    %9 = vector.broadcast %8 : i32 to vector<16x256xi32>
    %10 = arith.addi %7, %9 : vector<16x256xi32>
    %11 = vector.broadcast %6 : vector<16x1xi32> to vector<16x256xi32>
    %12 = arith.cmpi eq, %10, %11 : vector<16x256xi32>
    %cst_6 = arith.constant 0.000000e+00 : f32
    %13 = vector.broadcast %cst_6 : f32 to vector<16x256xf32>
    %14 = arith.select %12, %5, %13 : vector<16x256xi1>, vector<16x256xf32>
    %15 = vector.extract_strided_slice %5 {offsets = [0, 0], sizes = [16, 128], strides = [1, 1]} : vector<16x256xf32> to vector<16x128xf32>
    %16 = vector.extract_strided_slice %14 {offsets = [0, 0], sizes = [16, 128], strides = [1, 1]} : vector<16x256xf32> to vector<16x128xf32>
    %17 = vector.extract_strided_slice %5 {offsets = [0, 128], sizes = [16, 128], strides = [1, 1]} : vector<16x256xf32> to vector<16x128xf32>
    %18 = arith.maximumf %15, %17 : vector<16x128xf32>
    %19 = vector.extract_strided_slice %14 {offsets = [0, 128], sizes = [16, 128], strides = [1, 1]} : vector<16x256xf32> to vector<16x128xf32>
    %20 = arith.addf %16, %19 : vector<16x128xf32>
    %c0_7 = arith.constant 0 : index
    %c0_8 = arith.constant 0 : index
    %21 = vector.load %arg6[%c0_7, %c0_8] : memref<16x128xf32, #tpu.memory_space<vmem>>, vector<16x128xf32>
    %22 = arith.maximumf %21, %18 : vector<16x128xf32>
    %23 = vector.extract_strided_slice %5 {offsets = [0, 0], sizes = [16, 128], strides = [1, 1]} : vector<16x256xf32> to vector<16x128xf32>
    %24 = arith.subf %23, %22 : vector<16x128xf32>
    %25 = math.exp %24 : vector<16x128xf32>
    %26 = vector.extract_strided_slice %5 {offsets = [0, 128], sizes = [16, 128], strides = [1, 1]} : vector<16x256xf32> to vector<16x128xf32>
    %27 = arith.subf %26, %22 : vector<16x128xf32>
    %28 = math.exp %27 : vector<16x128xf32>
    %29 = arith.addf %25, %28 : vector<16x128xf32>
    %30 = arith.subf %21, %22 : vector<16x128xf32>
    %31 = math.exp %30 : vector<16x128xf32>
    %c0_9 = arith.constant 0 : index
    %c0_10 = arith.constant 0 : index
    %32 = vector.load %arg7[%c0_9, %c0_10] : memref<16x128xf32, #tpu.memory_space<vmem>>, vector<16x128xf32>
    %33 = arith.mulf %31, %32 : vector<16x128xf32>
    %34 = arith.addf %33, %29 : vector<16x128xf32>
    %c0_11 = arith.constant 0 : index
    %c0_12 = arith.constant 0 : index
    %35 = vector.load %arg7[%c0_11, %c0_12] : memref<16x128xf32, #tpu.memory_space<vmem>>, vector<16x128xf32>
    tpu.vector_store %arg7[%c0_11, %c0_12], %34 {strides = array<i32>} : memref<16x128xf32, #tpu.memory_space<vmem>>, vector<16x128xf32>,
    %c0_13 = arith.constant 0 : index
    %c0_14 = arith.constant 0 : index
    %36 = vector.load %arg6[%c0_13, %c0_14] : memref<16x128xf32, #tpu.memory_space<vmem>>, vector<16x128xf32>
    tpu.vector_store %arg6[%c0_13, %c0_14], %22 {strides = array<i32>} : memref<16x128xf32, #tpu.memory_space<vmem>>, vector<16x128xf32>,
    %c0_15 = arith.constant 0 : index
    %c0_16 = arith.constant 0 : index
    %37 = vector.load %arg8[%c0_15, %c0_16] : memref<16x128xf32, #tpu.memory_space<vmem>>, vector<16x128xf32>
    %38 = arith.addf %37, %20 : vector<16x128xf32>
    %c0_17 = arith.constant 0 : index
    %c0_18 = arith.constant 0 : index
    %39 = vector.load %arg8[%c0_17, %c0_18] : memref<16x128xf32, #tpu.memory_space<vmem>>, vector<16x128xf32>
    tpu.vector_store %arg8[%c0_17, %c0_18], %38 {strides = array<i32>} : memref<16x128xf32, #tpu.memory_space<vmem>>, vector<16x128xf32>,
    %c0_i32_19 = arith.constant 0 : i32
    %40 = arith.cmpi eq, %arg1, %c0_i32_19 : i32
    %41 = arith.extui %40 : i1 to i32
    %c0_i32_20 = arith.constant 0 : i32
    %42 = arith.cmpi ne, %41, %c0_i32_20 : i32
    scf.if %42 {
      %c0_21 = arith.constant 0 : index
      %c0_22 = arith.constant 0 : index
      %43 = vector.load %arg6[%c0_21, %c0_22] : memref<16x128xf32, #tpu.memory_space<vmem>>, vector<16x128xf32>
      %cst_23 = arith.constant dense<0xFF800000> : vector<16xf32>
      %44 = vector.multi_reduction <maximumf>, %43, %cst_23 [1] : vector<16x128xf32> to vector<16xf32>
      %45 = vector.shape_cast %44 : vector<16xf32> to vector<16x1xf32>
      %c0_24 = arith.constant 0 : index
      %c0_25 = arith.constant 0 : index
      %46 = vector.load %arg7[%c0_24, %c0_25] : memref<16x128xf32, #tpu.memory_space<vmem>>, vector<16x128xf32>
      %47 = vector.broadcast %45 : vector<16x1xf32> to vector<16x128xf32>
      %48 = arith.subf %43, %47 : vector<16x128xf32>
      %49 = math.exp %48 : vector<16x128xf32>
      %50 = arith.mulf %46, %49 : vector<16x128xf32>
      %cst_26 = arith.constant dense<0.000000e+00> : vector<16xf32>
      %51 = vector.multi_reduction <add>, %50, %cst_26 [1] : vector<16x128xf32> to vector<16xf32>
      %52 = vector.shape_cast %51 : vector<16xf32> to vector<16x1xf32>
      %c0_27 = arith.constant 0 : index
      %c0_28 = arith.constant 0 : index
      %53 = vector.load %arg8[%c0_27, %c0_28] : memref<16x128xf32, #tpu.memory_space<vmem>>, vector<16x128xf32>
      %cst_29 = arith.constant dense<0.000000e+00> : vector<16xf32>
      %54 = vector.multi_reduction <add>, %53, %cst_29 [1] : vector<16x128xf32> to vector<16xf32>
      %55 = vector.shape_cast %54 : vector<16xf32> to vector<16x1xf32>
      %c0_30 = arith.constant 0 : index
      %c0_31 = arith.constant 0 : index
      %56 = vector.load %arg3[%c0_30, %c0_31] : memref<16x1xi32, #tpu.memory_space<vmem>>, vector<16x1xi32>
      %c-100_i32 = arith.constant -100 : i32
      %57 = vector.broadcast %c-100_i32 : i32 to vector<16x1xi32>
      %58 = arith.cmpi ne, %56, %57 : vector<16x1xi32>
      %59 = math.log %52 : vector<16x1xf32>
      %60 = arith.addf %45, %59 : vector<16x1xf32>
      %61 = arith.subf %60, %55 : vector<16x1xf32>
      %cst_32 = arith.constant 0.000000e+00 : f32
      %62 = vector.broadcast %cst_32 : f32 to vector<16x1xf32>
      %63 = arith.select %58, %61, %62 : vector<16x1xi1>, vector<16x1xf32>
      %c0_33 = arith.constant 0 : index
      %c0_34 = arith.constant 0 : index
      %64 = vector.load %arg5[%c0_33, %c0_34] : memref<16x1xf32, #tpu.memory_space<vmem>>, vector<16x1xf32>
      tpu.vector_store %arg5[%c0_33, %c0_34], %63 {strides = array<i32>} : memref<16x1xf32, #tpu.memory_space<vmem>>, vector<16x1xf32>,
    } else {
    }
    return
  }
  func.func @transform_0(%arg0: i32, %arg1: i32) -> (i32, i32) {
    %c0_i32 = arith.constant 0 : i32
    %c0_i32_0 = arith.constant 0 : i32
    return %arg0, %c0_i32 : i32, i32
  }
  func.func @transform_1(%arg0: i32, %arg1: i32) -> (i32, i32) {
    %c0_i32 = arith.constant 0 : i32
    %c0_i32_0 = arith.constant 0 : i32
    return %arg0, %c0_i32 : i32, i32
  }
  func.func @transform_2(%arg0: i32, %arg1: i32) -> (i32, i32) {
    %c0_i32 = arith.constant 0 : i32
    %c0_i32_0 = arith.constant 0 : i32
    return %arg1, %c0_i32 : i32, i32
  }
  func.func @transform_3(%arg0: i32, %arg1: i32) -> (i32, i32) {
    %c0_i32 = arith.constant 0 : i32
    %c0_i32_0 = arith.constant 0 : i32
    return %arg0, %c0_i32 : i32, i32
  }
}

</mosaic_0001>

<bundles_post_ra>
// kernel: tpu_custom_call.1
= control target key start
LH: loop header
LB: loop body
LE: loop exit
PB: predicated region body
PF: predicated region fallthrough
CT: control target
= control target key end

     0   :  { %vm144_vm0 = vcmask 261120   ;;  %v440_v1 = vmov 0   ;;  %v241_v28 = vlaneseq  ;;  %vm349_vm6 = vcmask 7168   ;;  %s550_s2 = inlined_call_operand.vmem [shape: bf16[256,32], index: 2, kind: input, shape index: {}]   ;;  %s551_s0 = inlined_call_operand.vmem [shape: bf16[16,32], index: 0, kind: input, shape index: {}]   ;;  %s552_s1 = inlined_call_operand.vmem [shape: s32[16,1], index: 1, kind: input, shape index: {}]   ;;  %s553_s3 = inlined_call_operand.vmem [shape: f32[16,1], index: 3, kind: output, shape index: {}]  }
   0x1   :  { %v403_v0 = vld [vmem:[%s550_s2 + $0x40] sm:$0xff]   ;;  %401 = vset.pattern.permute.xlu1 %v440_v1  ;;  %402 = vset.pattern.permute.xlu0 %v440_v1  ;;  %v405_v3 = vld [vmem:[%s550_s2 + $0x48] sm:$0xff]   ;;  %v407_v7 = vld [vmem:[%s550_s2 + $0x50] sm:$0xff]  }
   0x2   :  { %v404_v2 = vld [vmem:[%s550_s2] sm:$0xff]   ;;  %392 = vmatprep.subr.msk.bf16.mxu0 %vm144_vm0, %v403_v0  ;;  %v406_v5 = vld [vmem:[%s550_s2 + $0x8] sm:$0xff]   ;;  %v408_v8 = vld [vmem:[%s550_s2 + $0x10] sm:$0xff]   ;;  %v242_v29 = vand.u32 127, %v241_v28 }
   0x3   :  { %v149_v4 = vsel %vm144_vm0, %v404_v2, 0  ;;  %v152_v6 = vsel %vm144_vm0, %v406_v5, 0  ;;  %v419_v9 = vld [vmem:[%s551_s0] sm:$0xff]   ;;  %v155_v10 = vsel %vm144_vm0, %v408_v8, 0  ;;  %v409_v11 = vld [vmem:[%s550_s2 + $0x58] sm:$0xff]   ;;  %v501_v13 = vld [vmem:[%s552_s1 + $0x8] sm:$0xff] }
   0x4   :  { %375 = vmatpush3.bf16.xpose.msra.mxu0 %v149_v4  ;;  %v494_v12 = vld [vmem:[%s552_s1] sm:$0xff]  ;;  %390 = vmatprep.mubr.msk.bf16.mxu0 %vm144_vm0, %v419_v9  ;;  %v410_v14 = vld [vmem:[%s550_s2 + $0x18] sm:$0xff]   ;;  %v413_v19 = vld [vmem:[%s550_s2 + $0x68] sm:$0xff]   ;;  %v243_v31 = vadd.s32 128, %v242_v29  ;;  %vm338_vm7 = vcmp.ne.s32.totalorder %v501_v13, 4294967196 }
   0x5   :  { %393 = vmatprep.subr.msk.bf16.mxu0 %vm144_vm0, %v405_v3  ;;  %249 = vperm.xlu1 %401, %v494_v12   ;;  %v158_v15 = vsel %vm144_vm0, %v410_v14, 0  ;;  %v411_v16 = vld [vmem:[%s550_s2 + $0x60] sm:$0xff]   ;;  %v414_v20 = vld [vmem:[%s550_s2 + $0x28] sm:$0xff]   ;;  %v415_v22 = vld [vmem:[%s550_s2 + $0x70] sm:$0xff]   ;;  %vm337_vm5 = vcmp.ne.s32.totalorder %v494_v12, 4294967196 }
   0x6   :  { %v412_v17 = vld [vmem:[%s550_s2 + $0x20] sm:$0xff]   ;;  %v164_v21 = vsel %vm144_vm0, %v414_v20, 0  ;;  %v416_v23 = vld [vmem:[%s550_s2 + $0x30] sm:$0xff]   ;;  %v417_v25 = vld [vmem:[%s550_s2 + $0x78] sm:$0xff]  }
   0x7   :  { %v161_v18 = vsel %vm144_vm0, %v412_v17, 0  ;;  %v167_v24 = vsel %vm144_vm0, %v416_v23, 0  ;;  %v418_v26 = vld [vmem:[%s550_s2 + $0x38] sm:$0xff]  }
   0x8   :  { %v170_v27 = vsel %vm144_vm0, %v418_v26, 0 }
   0x9   :  { %252 = vperm.xlu1 %401, %v501_v13  }
   0xc   :  { %377 = vmatpush3.bf16.xpose.msra.mxu0 %v152_v6 }
   0xd   :  { %394 = vmatprep.subr.msk.bf16.mxu0 %vm144_vm0, %v407_v7 }
  0x14   :  { %379 = vmatpush3.bf16.xpose.msra.mxu0 %v155_v10 }
  0x15   :  { %395 = vmatprep.subr.msk.bf16.mxu0 %vm144_vm0, %v409_v11 }
  0x1c   :  { %381 = vmatpush3.bf16.xpose.msra.mxu0 %v158_v15 }
  0x1d   :  { %396 = vmatprep.subr.msk.bf16.mxu0 %vm144_vm0, %v411_v16 }
  0x24   :  { %383 = vmatpush3.bf16.xpose.msra.mxu0 %v161_v18 }
  0x25   :  { %397 = vmatprep.subr.msk.bf16.mxu0 %vm144_vm0, %v413_v19 }
  0x2c   :  { %385 = vmatpush3.bf16.xpose.msra.mxu0 %v164_v21 }
  0x2d   :  { %398 = vmatprep.subr.msk.bf16.mxu0 %vm144_vm0, %v415_v22 }
  0x34   :  { %387 = vmatpush3.bf16.xpose.msra.mxu0 %v167_v24 }
  0x35   :  { %399 = vmatprep.subr.msk.bf16.mxu0 %vm144_vm0, %v417_v25 }
  0x3c   :  { %389 = vmatpush3.bf16.xpose.msra.mxu0 %v170_v27 }
  0x43   :  { %391 = vmatmul.mubr.msk.bf16.vlgmr.msra.gmra.mrb[0].mxu0 %vm144_vm0, %v419_v9 }
  0x84   :  { %v250_v30 = vpop.permute.xlu1 %249 }
  0x85   :  { %vm254_vm1 = vcmp.eq.s32.totalorder %v242_v29, %v250_v30  ;;  %vm255_vm2 = vcmp.eq.s32.totalorder %v243_v31, %v250_v30 }
  0x88   :  { %v253_v32 = vpop.permute.xlu1 %252 }
  0x89   :  { %vm256_vm3 = vcmp.eq.s32.totalorder %v242_v29, %v253_v32  ;;  %vm257_vm4 = vcmp.eq.s32.totalorder %v243_v31, %v253_v32 }
 0x116   :  { %v230_v33 = vpop.f32.mrb[0].mxu0 }
 0x117   :  { %v232_v34 = vpop.f32.mrb[1].mxu0  ;;  %v258_v35 = vsel %vm254_vm1, %v230_v33, 0.0 }
 0x118   :  { %v262_v36 = vmax.f32 %v230_v33, %v232_v34  ;;  %v234_v37 = vpop.f32.mrb[2].mxu0  ;;  %v259_v38 = vsel %vm255_vm2, %v232_v34, 0.0 }
 0x119   :  { %v236_v39 = vpop.f32.mrb[3].mxu0  ;;  %v264_v40 = vadd.f32 %v259_v38, %v258_v35  ;;  %v260_v41 = vsel %vm256_vm3, %v234_v37, 0.0 }
 0x11a   :  { %v270_v42 = vsub.f32 %v230_v33, %v262_v36  ;;  %v276_v43 = vsub.f32 %v232_v34, %v262_v36  ;;  %v261_v44 = vsel %vm257_vm4, %v236_v39, 0.0  ;;  %v263_v45 = vmax.f32 %v234_v37, %v236_v39  ;;  %311 = vmax.xlane.f32.xlu0 %v262_v36 }
 0x11b   :  { %v265_v46 = vadd.f32 %v261_v44, %v260_v41  ;;  %v284_v59 = vsub.f32 -inf, %v262_v36 }
 0x11c   :  { %v272_v47 = vmul.f32 1.442695, %v270_v42  ;;  %v278_v48 = vmul.f32 1.442695, %v276_v43  ;;  %v271_v49 = vsub.f32 %v234_v37, %v263_v45  ;;  %v277_v50 = vsub.f32 %v236_v39, %v263_v45 }
 0x11d   :  { %v286_v60 = vmul.f32 1.442695, %v284_v59  ;;  %v285_v61 = vsub.f32 -inf, %v263_v45 }
 0x11e   :  { %420 = vpow2.f32 %v278_v48  ;;  %v274_v51 = vmul.f32 1.442695, %v271_v49  ;;  %v280_v52 = vmul.f32 1.442695, %v277_v50  ;;  %313 = vmax.xlane.f32.xlu0 %v263_v45 }
 0x11f   :  { %422 = vpow2.f32 %v272_v47  ;;  %v288_v62 = vmul.f32 1.442695, %v285_v61 }
 0x120   :  { %424 = vpow2.f32 %v274_v51 }
 0x121   :  { %426 = vpow2.f32 %v280_v52 }
 0x122   :  { %428 = vpow2.f32 %v286_v60 }
 0x123   :  { %430 = vpow2.f32 %v288_v62 }
 0x128   :  { %v421_v53 = vpop.eup %420 }
 0x129   :  { %v423_v54 = vpop.eup %422 }
 0x12a   :  { %v425_v55 = vpop.eup %424  ;;  %v282_v56 = vadd.f32 %v423_v54, %v421_v53 }
 0x12b   :  { %v427_v57 = vpop.eup %426 }
 0x12c   :  { %v283_v58 = vadd.f32 %v427_v57, %v425_v55  ;;  %v429_v4 = vpop.eup %428 }
 0x12d   :  { %v292_v6 = vmul.f32 0.0, %v429_v4  ;;  %v431_v7 = vpop.eup %430 }
 0x12e   :  { %v293_v9 = vmul.f32 0.0, %v431_v7 }
 0x12f   :  { %v294_v8 = vadd.f32 %v292_v6, %v282_v56 }
 0x130   :  { %v295_v14 = vadd.f32 %v293_v9, %v283_v58 }
 0x1a7   :  { %v312_v63 = vpop.xlane.xlu0 %311 }
 0x1a8   :  { %v317_v0 = vsub.f32 %v262_v36, %v312_v63 }
 0x1aa   :  { %v319_v1 = vmul.f32 1.442695, %v317_v0 }
 0x1ab   :  { %v314_v2 = vpop.xlane.xlu0 %313 }
 0x1ac   :  { %432 = vpow2.f32 %v319_v1  ;;  %v318_v3 = vsub.f32 %v263_v45, %v314_v2 }
 0x1ae   :  { %v321_v5 = vmul.f32 1.442695, %v318_v3 }
 0x1b0   :  { %434 = vpow2.f32 %v321_v5 }
 0x1b6   :  { %v433_v10 = vpop.eup %432 }
 0x1b7   :  { %v323_v11 = vmul.f32 %v433_v10, %v294_v8 }
 0x1b9   :  { %325 = vadd.xlane.f32.xlu0 %v323_v11 }
 0x1ba   :  { %v435_v15 = vpop.eup %434 }
 0x1bb   :  { %v324_v16 = vmul.f32 %v435_v15, %v295_v14 }
 0x1bd   :  { %331 = vadd.xlane.f32.xlu0 %v264_v40  ;;  %327 = vadd.xlane.f32.xlu1 %v324_v16 }
 0x1c1   :  { %333 = vadd.xlane.f32.xlu0 %v265_v46 }
 0x246   :  { %v326_v17 = vpop.xlane.xlu0 %325 }
 0x247   :  { %436 = vlog2.f32 %v326_v17 }
 0x24a   :  { %v328_v18 = vpop.xlane.xlu1 %327  ;;  %v332_v21 = vpop.xlane.xlu0 %331 }
 0x24b   :  { %438 = vlog2.f32 %v328_v18 }
 0x24e   :  { %v334_v28 = vpop.xlane.xlu0 %333 }
 0x251   :  { %v437_v19 = vpop.eup %436 }
 0x252   :  { %v340_v20 = vmul.f32 0.6931472, %v437_v19 }
 0x254   :  { %v343_v22 = vadd.f32 %v340_v20, %v312_v63 }
 0x255   :  { %v439_v23 = vpop.eup %438 }
 0x256   :  { %v345_v24 = vsub.f32 %v343_v22, %v332_v21  ;;  %v342_v25 = vmul.f32 0.6931472, %v439_v23 }
 0x258   :  { %v347_v26 = vsel %vm337_vm5, %v345_v24, 0.0  ;;  %v344_v27 = vadd.f32 %v342_v25, %v314_v2 }
 0x259   :  { %350 = vst.msk [vmem:[%s553_s3] sm:$0xff] %vm349_vm6, %v347_v26 }
 0x25a   :  { %v346_v29 = vsub.f32 %v344_v27, %v334_v28 }
 0x25c   :  { %v348_v30 = vsel %vm338_vm7, %v346_v29, 0.0 }
 0x25d   :  { %351 = vst.msk [vmem:[%s553_s3 + $0x8] sm:$0xff] %vm349_vm6, %v348_v30 }

</bundles_post_ra>
